<compile_context>
chip_gen: v7x
topology: tpu7x:2x2x1
jax: 0.10.0
libtpu: 0.0.40
codegen_flags: <defaults>
</compile_context>

<pallas_src>
import functools

import jax
import jax.numpy as jnp
import numpy as np
from jax.experimental import pallas as pl
from jax.experimental.pallas import tpu as pltpu

_LANE = 128
_SUBLANE = 8
_TILE = _LANE * _SUBLANE          # 1024 elements per full (8, 128) f32 tile


def _round_up(a, b):
    return ((a + b - 1) // b) * b


def _interp_kernel_midpoint(x_ref, o_ref, *, x_first, x_last, mids, xlo, ylo, slope):
    """Piecewise-linear eval of one (block_rows, 128) f32 tile.

    Sorted, distinct breakpoints: argmin over the first P-1 breakpoints equals
    the number of midpoints strictly below xc.  Per interior breakpoint this is
    1 compare + 3 selects (pure VPU), then one dx/mul/add at the end.  Strict
    '>' keeps the lower index on exact midpoint ties (torch.argmin behaviour).
    """
    x = x_ref[...]
    xc = jnp.minimum(jnp.maximum(x, x_first), x_last)

    x_sel = jnp.full(xc.shape, xlo[0], xc.dtype)
    y_sel = jnp.full(xc.shape, ylo[0], xc.dtype)
    s_sel = jnp.full(xc.shape, slope[0], xc.dtype)
    for p in range(1, len(slope)):
        adv = xc > mids[p - 1]
        x_sel = jnp.where(adv, xlo[p], x_sel)
        y_sel = jnp.where(adv, ylo[p], y_sel)
        s_sel = jnp.where(adv, slope[p], s_sel)

    o_ref[...] = y_sel + s_sel * (xc - x_sel)


def _interp_kernel_absscan(x_ref, o_ref, *, xp, ylo, slope):
    """Fallback form: running |d| scan, exact for duplicate x_points (inf/NaN
    reproduced like the PyTorch reference).  Strict '<' => first occurrence."""
    x = x_ref[...]
    xc = jnp.minimum(jnp.maximum(x, xp[0]), xp[-1])
    dx = xc - xp[0]
    d_min = jnp.abs(dx)
    y = ylo[0] + slope[0] * dx
    for p in range(1, len(slope)):
        dx = xc - xp[p]
        d = jnp.abs(dx)
        y_p = ylo[p] + slope[p] * dx
        take = d < d_min
        y = jnp.where(take, y_p, y)
        d_min = jnp.minimum(d_min, d)
    o_ref[...] = y


class InterpolationLayer:
    """JAX/Pallas port of nnodely Interpolation_Layer (mode='linear')."""

    def __init__(self, x_points, y_points, mode="linear",
                 max_block_rows=2048, min_pallas_batch=32768):
        if mode != "linear":
            raise NotImplementedError
        self.mode = mode
        self.max_block_rows = int(max_block_rows)
        self.min_pallas_batch = int(min_pallas_batch)

        xp = np.asarray(x_points, dtype=np.float32).reshape(-1)
        yp = np.asarray(y_points, dtype=np.float32).reshape(-1)
        if xp.shape != yp.shape or xp.size < 2:
            raise ValueError("x_points / y_points must be 1-D with >= 2 points")
        order = np.argsort(xp, kind="stable")
        xp = xp[order]
        yp = yp[order]
        self._P = int(xp.size)

        # Host f32 divide is bitwise identical to the per-element f32 divide
        # PyTorch performs; duplicate x_points yield inf/NaN as in the module.
        with np.errstate(divide="ignore", invalid="ignore"):
            slope = (yp[1:] - yp[:-1]) / (xp[1:] - xp[:-1])

        # jnp copies (also used by the fused-XLA small-batch / tail path).
        self.x_points = jnp.asarray(xp)[:, None]       # (P, 1), sorted
        self.y_points = jnp.asarray(yp)[:, None]       # (P, 1), permuted alike
        self._xp_flat = jnp.asarray(xp)
        self._yp_flat = jnp.asarray(yp)

        # TODO(synk): for large breakpoint tables (P >~ 64) switch the baked
        # immediates / Python unroll to SMEM tables + lax.fori_loop(unroll=k).
        has_dup = bool(np.any(np.diff(xp) == 0.0))
        if has_dup:
            self._kernel = functools.partial(
                _interp_kernel_absscan,
                xp=tuple(float(v) for v in xp),
                ylo=tuple(float(v) for v in yp[:-1]),
                slope=tuple(float(v) for v in slope))
        else:
            mids = ((xp[:-2] + xp[1:-1]) * np.float32(0.5)).astype(np.float32)
            self._kernel = functools.partial(
                _interp_kernel_midpoint,
                x_first=float(xp[0]), x_last=float(xp[-1]),
                mids=tuple(float(v) for v in mids),
                xlo=tuple(float(v) for v in xp[:-1]),
                ylo=tuple(float(v) for v in yp[:-1]),
                slope=tuple(float(v) for v in slope))

    # ---- fused-XLA closed form (small batches and unaligned tails) ----------
    def _jnp_interp(self, xf):
        xp = self._xp_flat
        yp = self._yp_flat
        xc = jnp.minimum(jnp.maximum(xf, xp[0]), xp[-1])
        d = jnp.abs(xp[:-1][None, :] - xc[:, None])       # (n, P-1)
        idx = jnp.argmin(d, axis=1)                        # first occurrence
        x_lo = xp[idx]
        y_lo = yp[idx]
        return y_lo + (yp[idx + 1] - y_lo) / (xp[idx + 1] - x_lo) * (xc - x_lo)

    # ---- forward -------------------------------------------------------------
    def __call__(self, x):
        if self.mode != "linear":
            raise NotImplementedError
        # nnodely convention: x is (batch, window=1, dim=1)
        assert x.ndim == 3 and x.shape[1] == 1 and x.shape[2] == 1
        B = int(x.shape[0])
        flat = x.reshape(B).astype(jnp.float32)

        # Small-batch fast path: pallas_call launch overhead dominates here.
        if B < max(self.min_pallas_batch, _TILE):
            return self._jnp_interp(flat).reshape(B, 1, 1)

        # Kernel over the 1024-aligned prefix (contiguous slice, free reshape).
        B_main = (B // _TILE) * _TILE
        rows = B_main // _LANE                             # multiple of 8
        # >=2 grid steps whenever possible (v7x 2-TC split), capped at ~1 MiB
        # per buffer (2048 rows) -- fits scoped-VMEM defaults on v5e/v6e/v7x.
        block_rows = min(self.max_block_rows,
                         max(_SUBLANE, _round_up(pl.cdiv(rows, 2), _SUBLANE)))
        grid = (pl.cdiv(rows, block_rows),)

        n_elems = rows * _LANE
        cost = pl.CostEstimate(
            flops=(4 * max(self._P - 2, 0) + 5) * n_elems,
            transcendentals=0,
            bytes_accessed=2 * n_elems * 4)

        out_main = pl.pallas_call(
            self._kernel,
            out_shape=jax.ShapeDtypeStruct((rows, _LANE), jnp.float32),
            grid=grid,
            in_specs=[pl.BlockSpec((block_rows, _LANE), lambda i: (i, 0))],
            out_specs=pl.BlockSpec((block_rows, _LANE), lambda i: (i, 0)),
            compiler_params=pltpu.CompilerParams(
                dimension_semantics=("parallel",)),
            cost_estimate=cost,
        )(flat[:B_main].reshape(rows, _LANE)).reshape(B_main)

        if B_main == B:
            return out_main.reshape(B, 1, 1)
        # <=1023-element unaligned tail: closed-form jnp; no pad/slice copies.
        tail = self._jnp_interp(flat[B_main:])
        return jnp.concatenate([out_main, tail]).reshape(B, 1, 1)


def _torch_semantics_ref(x, xp, yp):
    """Pure-JAX replica of the exact PyTorch forward (for verification)."""
    xc = jnp.minimum(jnp.maximum(x, xp[0]), xp[-1])        # (B, 1, 1)
    d = jnp.abs(xp[:-1] - xc)                               # (B, P-1, 1)
    idx = jnp.argmin(d, axis=1)                             # (B, 1)
    y = yp[idx] + (yp[idx + 1] - yp[idx]) / (xp[idx + 1] - xp[idx]) * (xc - xp[idx])
    return y                                                # (B, 1, 1)


if __name__ == "__main__":
    # Breakpoints given unsorted (the module sorts them): y = x^2 at the knots.
    x_points = [0.0, 1.0, 3.0, 2.0, 5.0, 4.0]
    y_points = [0.0, 1.0, 9.0, 4.0, 25.0, 16.0]

    k1, k2, k3 = jax.random.split(jax.random.PRNGKey(0), 3)

    # 1) Pallas path, aligned batch, small forced block -> 2-step grid.
    layer = InterpolationLayer(x_points, y_points, mode="linear",
                               max_block_rows=8, min_pallas_batch=0)
    B1 = 2048
    x1 = jax.random.uniform(k1, (B1, 1, 1), dtype=jnp.float32,
                            minval=-1.0, maxval=6.0)        # exercises clamping
    y1 = jax.block_until_ready(layer(x1))
    r1 = _torch_semantics_ref(x1, layer.x_points, layer.y_points)
    assert y1.shape == (B1, 1, 1)
    np.testing.assert_allclose(np.asarray(y1), np.asarray(r1), rtol=1e-5, atol=1e-5)

    # 2) Pallas path with default block size + unaligned tail (prefix kernel
    #    + fused-jnp tail, no pad / slice copies).
    layer2 = InterpolationLayer(x_points, y_points, mode="linear",
                                min_pallas_batch=0)
    B2 = 3000
    x2 = jax.random.uniform(k2, (B2, 1, 1), dtype=jnp.float32,
                            minval=-1.0, maxval=6.0)
    y2 = jax.block_until_ready(layer2(x2))
    r2 = _torch_semantics_ref(x2, layer2.x_points, layer2.y_points)
    assert y2.shape == (B2, 1, 1)
    np.testing.assert_allclose(np.asarray(y2), np.asarray(r2), rtol=1e-5, atol=1e-5)

    # 3) Small-batch fused-XLA fast path (default threshold, no kernel launch).
    layer3 = InterpolationLayer(x_points, y_points, mode="linear")
    B3 = 8
    x3 = jax.random.uniform(k3, (B3, 1, 1), dtype=jnp.float32,
                            minval=-1.0, maxval=6.0)
    y3 = jax.block_until_ready(layer3(x3))
    r3 = _torch_semantics_ref(x3, layer3.x_points, layer3.y_points)
    assert y3.shape == (B3, 1, 1)
    np.testing.assert_allclose(np.asarray(y3), np.asarray(r3), rtol=1e-5, atol=1e-5)

    print("KERNEL_OK")
</pallas_src>

<mosaic_0001>
module attributes {stable_mosaic.version = 11 : i64} {
  func.func @_interp_kernel_midpoint(%arg0: i32, %arg1: memref<8x128xf32, #tpu.memory_space<vmem>>, %arg2: memref<8x128xf32, #tpu.memory_space<vmem>>) attributes {dimension_semantics = [#tpu.dimension_semantics<parallel>], iteration_bounds = array<i64: 2>, scalar_prefetch = 0 : i64, scratch_operands = 0 : i64, tpu.core_type = #tpu.core_type<tc>, window_params = [{transform_indices = @transform_0, window_bounds = array<i64: 8, 128>}, {transform_indices = @transform_1, window_bounds = array<i64: 8, 128>}]} {
    %c0 = arith.constant 0 : index
    %c0_0 = arith.constant 0 : index
    %0 = vector.load %arg1[%c0, %c0_0] : memref<8x128xf32, #tpu.memory_space<vmem>>, vector<8x128xf32>
    %cst = arith.constant 0.000000e+00 : f32
    %1 = vector.broadcast %cst : f32 to vector<8x128xf32>
    %2 = arith.maximumf %0, %1 : vector<8x128xf32>
    %cst_1 = arith.constant 5.000000e+00 : f32
    %3 = vector.broadcast %cst_1 : f32 to vector<8x128xf32>
    %4 = arith.minimumf %2, %3 : vector<8x128xf32>
    %cst_2 = arith.constant 0.000000e+00 : f32
    %5 = vector.broadcast %cst_2 : f32 to vector<8x128xf32>
    %cst_3 = arith.constant 0.000000e+00 : f32
    %6 = vector.broadcast %cst_3 : f32 to vector<8x128xf32>
    %cst_4 = arith.constant 1.000000e+00 : f32
    %7 = vector.broadcast %cst_4 : f32 to vector<8x128xf32>
    %cst_5 = arith.constant 5.000000e-01 : f32
    %8 = vector.broadcast %cst_5 : f32 to vector<8x128xf32>
    %9 = arith.cmpf ogt, %4, %8 : vector<8x128xf32>
    %cst_6 = arith.constant 1.000000e+00 : f32
    %10 = vector.broadcast %cst_6 : f32 to vector<8x128xf32>
    %11 = arith.select %9, %10, %5 : vector<8x128xi1>, vector<8x128xf32>
    %cst_7 = arith.constant 1.000000e+00 : f32
    %12 = vector.broadcast %cst_7 : f32 to vector<8x128xf32>
    %13 = arith.select %9, %12, %6 : vector<8x128xi1>, vector<8x128xf32>
    %cst_8 = arith.constant 3.000000e+00 : f32
    %14 = vector.broadcast %cst_8 : f32 to vector<8x128xf32>
    %15 = arith.select %9, %14, %7 : vector<8x128xi1>, vector<8x128xf32>
    %cst_9 = arith.constant 1.500000e+00 : f32
    %16 = vector.broadcast %cst_9 : f32 to vector<8x128xf32>
    %17 = arith.cmpf ogt, %4, %16 : vector<8x128xf32>
    %cst_10 = arith.constant 2.000000e+00 : f32
    %18 = vector.broadcast %cst_10 : f32 to vector<8x128xf32>
    %19 = arith.select %17, %18, %11 : vector<8x128xi1>, vector<8x128xf32>
    %cst_11 = arith.constant 4.000000e+00 : f32
    %20 = vector.broadcast %cst_11 : f32 to vector<8x128xf32>
    %21 = arith.select %17, %20, %13 : vector<8x128xi1>, vector<8x128xf32>
    %cst_12 = arith.constant 5.000000e+00 : f32
    %22 = vector.broadcast %cst_12 : f32 to vector<8x128xf32>
    %23 = arith.select %17, %22, %15 : vector<8x128xi1>, vector<8x128xf32>
    %cst_13 = arith.constant 2.500000e+00 : f32
    %24 = vector.broadcast %cst_13 : f32 to vector<8x128xf32>
    %25 = arith.cmpf ogt, %4, %24 : vector<8x128xf32>
    %cst_14 = arith.constant 3.000000e+00 : f32
    %26 = vector.broadcast %cst_14 : f32 to vector<8x128xf32>
    %27 = arith.select %25, %26, %19 : vector<8x128xi1>, vector<8x128xf32>
    %cst_15 = arith.constant 9.000000e+00 : f32
    %28 = vector.broadcast %cst_15 : f32 to vector<8x128xf32>
    %29 = arith.select %25, %28, %21 : vector<8x128xi1>, vector<8x128xf32>
    %cst_16 = arith.constant 7.000000e+00 : f32
    %30 = vector.broadcast %cst_16 : f32 to vector<8x128xf32>
    %31 = arith.select %25, %30, %23 : vector<8x128xi1>, vector<8x128xf32>
    %cst_17 = arith.constant 3.500000e+00 : f32
    %32 = vector.broadcast %cst_17 : f32 to vector<8x128xf32>
    %33 = arith.cmpf ogt, %4, %32 : vector<8x128xf32>
    %cst_18 = arith.constant 4.000000e+00 : f32
    %34 = vector.broadcast %cst_18 : f32 to vector<8x128xf32>
    %35 = arith.select %33, %34, %27 : vector<8x128xi1>, vector<8x128xf32>
    %cst_19 = arith.constant 1.600000e+01 : f32
    %36 = vector.broadcast %cst_19 : f32 to vector<8x128xf32>
    %37 = arith.select %33, %36, %29 : vector<8x128xi1>, vector<8x128xf32>
    %cst_20 = arith.constant 9.000000e+00 : f32
    %38 = vector.broadcast %cst_20 : f32 to vector<8x128xf32>
    %39 = arith.select %33, %38, %31 : vector<8x128xi1>, vector<8x128xf32>
    %40 = arith.subf %4, %35 : vector<8x128xf32>
    %41 = arith.mulf %39, %40 : vector<8x128xf32>
    %42 = arith.addf %37, %41 : vector<8x128xf32>
    %c0_21 = arith.constant 0 : index
    %c0_22 = arith.constant 0 : index
    %43 = vector.load %arg2[%c0_21, %c0_22] : memref<8x128xf32, #tpu.memory_space<vmem>>, vector<8x128xf32>
    tpu.vector_store %arg2[%c0_21, %c0_22], %42 {strides = array<i32>} : memref<8x128xf32, #tpu.memory_space<vmem>>, vector<8x128xf32>,
    return
  }
  func.func @transform_0(%arg0: i32) -> (i32, i32) {
    %c0_i32 = arith.constant 0 : i32
    %c0_i32_0 = arith.constant 0 : i32
    return %arg0, %c0_i32 : i32, i32
  }
  func.func @transform_1(%arg0: i32) -> (i32, i32) {
    %c0_i32 = arith.constant 0 : i32
    %c0_i32_0 = arith.constant 0 : i32
    return %arg0, %c0_i32 : i32, i32
  }
}

</mosaic_0001>

<bundles_post_ra>
// kernel: tpu_custom_call.1
= control target key start
LH: loop header
LB: loop body
LE: loop exit
PB: predicated region body
PF: predicated region fallthrough
CT: control target
= control target key end

     0   :  { %6 = vsyncpa [#allocation3], 0  ;;  %s571_s0 = inlined_call_operand.hbm [shape: f32[16,128], index: 0, kind: input, shape index: {}]   ;;  %s572_s1 = inlined_call_operand.hbm [shape: f32[16,128], index: 1, kind: output, shape index: {}]  }
   0x1   :  { %8 = vsyncpa [#allocation3 + $0x1], 0 }
   0x2   :  { %9 = vsyncpa [#allocation4], 0 }
   0x3   :  { %11 = vsyncpa [#allocation4 + $0x1], 0  ;;  %s410_s6 = smov 0   ;;  %s412_s7 = smov 0  }
   0x4   :  { %s414_s8 = smov 0   ;;  %s416_s9 = smov 0  }
   0x5 LB: > { %s431_s10 = sadd.s32 4294967295, %s394_s9   ;;  %s238_s11 = sadd.s32 4294967294, %s394_s9   ;;  %s394_s9 = sphi %s416_s9, %s587_s9   ;;  %s390_s8 = sphi %s414_s8, %s586_s8   ;;  %s386_s7 = sphi %s412_s7, %s585_s7   ;;  %s382_s6 = sphi %s410_s6, %s584_s6  }
   0x6   : > { %s435_s12 = sadd.s32 1, %s394_s9   ;;  %s24_s13 = sadd.s32 1, %s390_s8 }
   0x7   : > { %s21_s14 = ssub.s32 %s394_s9, %s435_s12  ;;  %p31_p0 = scmp.ne.s32.totalorder %s390_s8, %s386_s7 }
   0x8   : > { %p22_p1 = scmp.eq.s32.totalorder %s21_s14, 0  ;;  %p32_p2 = scmp.eq.s32.totalorder %s394_s9, 0 }
   0x9   : > { %p37_p3 = scmp.ne.s32.totalorder %s386_s7, %s382_s6  ;;  %p38_p4 = scmp.eq.s32.totalorder %s431_s10, 0 }
   0xa   : > { %s447_s15 = scalar_select %p22_p1, %s390_s8, %s24_s13  }
   0xb   : > { %p449_p5 = por %p32_p2, %p31_p0  ;;  %p453_p6 = por %p38_p4, %p37_p3 }
   0xc   : > { %p61_p7 = scmp.eq.s32.totalorder %s431_s10, 1  ;;  %p67_p8 = scmp.eq.s32.totalorder %s238_s11, 1 }
   0xd   : > { %p262_p10 = scmp.lt.s32.totalorder %s394_s9, 2  ;;  %s87_s20 = sand.u32 1, %s390_s8  }
   0xe   : > { %p460_p11 = por %p61_p7, %p31_p0  ;;  %p464_p12 = por %p67_p8, %p37_p3 }
   0xf   : > { %s242_s21 = sshll.u32 %s394_s9, 7  ;;  %s241_s22 = sshll.u32 %s87_s20, 3 }
  0x10   : > { %s576_s18 = scalar_select %p460_p11, 1, 0 }
  0x11   : > { %s577_s19 = scalar_select %p464_p12, 1, 0 }
  0x12   : > { %s473_s25 = scalar_lea.hbm %s571_s0, %s242_s21  ;;  %s91_s26 = scalar_lea.vmem [#allocation2], %s241_s22 }
  0x13   : > { %s98_s27 = sshll.u32 %s91_s26, 4  ;;  %p477_p13 = pnand %p262_p10, %p449_p5  ;;  %s481_s27 = int_to_ptr.vmem [resolvable:$true] %s98_s27 }
  0x14   : > { %s88_s29 = scalar_lea.sflag [#allocation3], %s87_s20  ;;  %s298_s30 = scalar_lea.hbm %s473_s25, 128 }
  0x15   : > { %p299_p2 = scmp.ne.s32.totalorder %s473_s25, %s298_s30  ;;  %p300_p3 = pneg %p477_p13 }
  0x16   : > { %s303_s4 = scalar_lea.hbm %s571_s0, 256  ;;  %p304_p5 = scmp.lt.u32.totalorder %s473_s25, %s571_s0 }
  0x17   : > { %p301_p4 = pnand %p300_p3, %p299_p2  ;;  %p305_p8 = scmp.lt.u32.totalorder %s303_s4, %s298_s30 }
  0x18   : > { %p307_p9 = scmp.lt.u32.totalorder %s298_s30, %s473_s25 }
  0x19   : > { %p302_p7 = pneg %p301_p4  ;;  %p306_p10 = por %p305_p8, %p304_p5 }
  0x1b   : > { %p308_p0 = por %p307_p9, %p306_p10 }
  0x1d   : > { %p309_p1 = pnand %p308_p0, %p302_p7 }
  0x1f   : > { %312 = shalt.err (!%p309_p1)
}
  0x20   : > { %s313_s13 = scalar_lea.vmem %s481_s27, 128  ;;  %s396_s14 = smov [#allocation2]  }
  0x21   : > { %p314_p2 = scmp.ne.s32.totalorder %s481_s27, %s313_s13  ;;  %s318_s16 = sshll.u32 %s396_s14, 4  ;;  %s319_s16 = int_to_ptr.vmem [resolvable:$false] %s318_s16 }
  0x22   : > { %s320_s20 = scalar_lea.vmem %s319_s16, 256  ;;  %p321_p11 = scmp.lt.s32.totalorder %s481_s27, %s319_s16 }
  0x23   : > { %p316_p4 = pnand %p314_p2, %p300_p3  ;;  %p322_p5 = scmp.lt.s32.totalorder %s320_s20, %s313_s13 }
  0x25   : > { %p317_p12 = pneg %p316_p4  ;;  %p323_p8 = por %p322_p5, %p321_p11 }
  0x27   : > { %p324_p9 = pnand %p323_p8, %p317_p12 }
  0x29   : > { %327 = shalt.err (!%p324_p9)
}
  0x2a   : > { %257 = dma.hbm_to_vmem [thread:$0]  (!%p477_p13), %s473_s25, 128, %s481_s27, %s88_s29  }
  0x2b   : > { %p579_p0 = scmp.lt.s32.totalorder %s394_s9, 3  ;;  %p580_p1 = scmp.ge.s32.totalorder %s394_s9, 1 }
  0x2d   : > { %p104_p3 = pnand %p580_p1, %p579_p0 }
  0x2e   : > { %s515_s21 = sand.u32 (!%p104_p3), 1, %s386_s7  }
  0x2f   : > { %107 = sbr.rel (%p104_p3) target bundleno = 85 (0x55), region = 24  ;;  %s244_s22 = sshll.u32 (!%p104_p3), %s515_s21, 3 }
  0x30   : > { %s110_s23 = scalar_lea.sflag (!%p104_p3), [#allocation3], %s515_s21  ;;  %s113_s24 = scalar_lea.vmem (!%p104_p3), [#allocation2], %s244_s22 }
  0x36   : > { %373 = dma.done.wait (%p453_p6), %s110_s23, 128  }
  0x37   : > { %375 = vsyncadd (%p453_p6), %s110_s23, 4294967168  ;;  %v132_v0 = vld [vmem:[%s113_s24] sm:$0xff]  ;;  %v397_v3 = vmov 0.0   ;;  %v398_v5 = vmov 1.0   ;;  %s131_s17 = scalar_lea.vmem [#allocation5], %s244_s22  ;;  %s247_s26 = sshll.u32 %s431_s10, 7 }
  0x38   : > { %v133_v1 = vmax.f32 %v132_v0, 0.0  ;;  %s168_s25 = sshll.u32 %s131_s17, 4  ;;  %s529_s29 = scalar_lea.hbm %s572_s1, %s247_s26  ;;  %s524_s25 = int_to_ptr.vmem [resolvable:$true] %s168_s25 }
  0x39   : > { %s155_s30 = scalar_lea.sflag [#allocation4], %s515_s21  ;;  %s328_s2 = scalar_lea.vmem %s524_s25, 128 }
  0x3a   : > { %v134_v2 = vmin.f32 %v133_v1, 5.0  ;;  %p329_p6 = scmp.ne.s32.totalorder %s524_s25, %s328_s2  ;;  %p581_p11 = scmp.ne.s32.totalorder %s576_s18, 0 }
  0x3b   : > { %s399_s10 = smov [#allocation5]  }
  0x3c   : > { %vm135_vm0 = vcmp.gt.f32.partialorder %v134_v2, 0.5  ;;  %vm138_vm1 = vcmp.gt.f32.partialorder %v134_v2, 1.5  ;;  %vm142_vm2 = vcmp.gt.f32.partialorder %v134_v2, 2.5  ;;  %vm146_vm3 = vcmp.gt.f32.partialorder %v134_v2, 3.5  ;;  %p330_p12 = pnand %p329_p6, %p581_p11  ;;  %s332_s3 = sshll.u32 %s399_s10, 4  ;;  %s333_s3 = int_to_ptr.vmem [resolvable:$false] %s332_s3 }
  0x3d   : > { %v136_v4 = vsel %vm135_vm0, 1.0, %v397_v3  ;;  %v137_v6 = vsel %vm135_vm0, 3.0, %v398_v5  ;;  %s334_s4 = scalar_lea.vmem %s333_s3, 256  ;;  %p335_p7 = scmp.lt.s32.totalorder %s524_s25, %s333_s3 }
  0x3e   : > { %v139_v7 = vsel %vm138_vm1, 2.0, %v136_v4  ;;  %v140_v8 = vsel %vm138_vm1, 4.0, %v136_v4  ;;  %v141_v9 = vsel %vm138_vm1, 5.0, %v137_v6  ;;  %p331_p13 = pneg %p330_p12  ;;  %p336_p10 = scmp.lt.s32.totalorder %s334_s4, %s328_s2 }
  0x3f   : > { %v143_v10 = vsel %vm142_vm2, 3.0, %v139_v7  ;;  %v144_v11 = vsel %vm142_vm2, 9.0, %v140_v8  ;;  %v145_v12 = vsel %vm142_vm2, 7.0, %v141_v9 }
  0x40   : > { %v147_v13 = vsel %vm146_vm3, 4.0, %v143_v10  ;;  %v149_v14 = vsel %vm146_vm3, 9.0, %v145_v12  ;;  %v148_v16 = vsel %vm146_vm3, 16.0, %v144_v11  ;;  %p337_p2 = por %p336_p10, %p335_p7 }
  0x41   : > { %v150_v15 = vsub.f32 %v134_v2, %v147_v13 }
  0x42   : > { %p338_p4 = pnand %p337_p2, %p331_p13 }
  0x43   : > { %v151_v17 = vmul.f32 %v150_v15, %v149_v14 }
  0x45   : > { %v152_v18 = vadd.f32 %v151_v17, %v148_v16 }
  0x47   : > { %153 = vst [vmem:[%s131_s17] sm:$0xff] %v152_v18 }
  0x48   : > { %341 = shalt.err (!%p338_p4)
}
  0x49   : > { %s342_s5 = scalar_lea.hbm %s529_s29, 128  ;;  %s346_s14 = scalar_lea.hbm %s572_s1, 256 }
  0x4a   : > { %p343_p5 = scmp.ne.s32.totalorder %s529_s29, %s342_s5  ;;  %p347_p0 = scmp.lt.u32.totalorder %s529_s29, %s572_s1 }
  0x4b   : > { %p348_p1 = scmp.lt.u32.totalorder %s346_s14, %s342_s5  ;;  %p350_p6 = scmp.lt.u32.totalorder %s342_s5, %s529_s29 }
  0x4c   : > { %p344_p8 = pnand %p343_p5, %p581_p11 }
  0x4d   : > { %p349_p3 = por %p348_p1, %p347_p0 }
  0x4e   : > { %p345_p9 = pneg %p344_p8 }
  0x4f   : > { %p351_p12 = por %p350_p6, %p349_p3 }
  0x51   : > { %p352_p13 = pnand %p351_p12, %p345_p9 }
  0x53   : > { %355 = shalt.err (!%p352_p13)
}
  0x54   : > { %252 = dma.vmem_to_hbm [thread:$0]  (%p581_p11), %s524_s25, 128, %s529_s29, %s155_s30  }
  0x55 PF: > { %s180_s21 = sand.u32 1, %s382_s6   ;;  %p582_p7 = scmp.ne.s32.totalorder %s577_s19, 0 }
  0x56   : > { %p583_p10 = scmp.ge.s32.totalorder %s394_s9, 2  ;;  %s181_s22 = scalar_lea.sflag [#allocation4], %s180_s21 }
  0x58   : > { %p259_p2 = pnand %p583_p10, %p582_p7 }
  0x5a   : > { %377 = dma.done.wait (!%p259_p2), %s181_s22, 128  }
  0x5b   : > { %379 = vsyncadd (!%p259_p2), %s181_s22, 4294967168  ;;  %p14_p4 = scmp.ge.s32.totalorder %s435_s12, 4   ;;  %s584_s6 = smov %s386_s7 }
  0x5c   : > { %s585_s7 = smov %s390_s8  ;;  %s586_s8 = smov %s447_s15 }
  0x5d   : > { %s587_s9 = smov %s435_s12  ;;  %16 = sbr.rel (!%p14_p4) target bundleno = 5 (0x5), region = 69 }
  0x64   :  { %186 = vsyncpa [#allocation3], 1 }
  0x65   :  { %188 = vsyncpa [#allocation3 + $0x1], 1 }
  0x66   :  { %189 = vsyncpa [#allocation4], 1 }
  0x67   :  { %191 = vsyncpa [#allocation4 + $0x1], 1 }

</bundles_post_ra>
